<compile_context>
chip_gen: v6e
topology: v6e:2x2x1
jax: 0.10.0
libtpu: 0.0.40
codegen_flags: <defaults>
</compile_context>

<pallas_src>
import jax
import jax.numpy as jnp
from jax.experimental import pallas as pl
from jax.experimental.pallas import tpu as pltpu

# column indices into the packed AMR node feature matrix (as in the original code)
AMR_CAT = 0
AMR_LE = 1


# ----------------------------------------------------------------------------
# Row tiling helper
# ----------------------------------------------------------------------------
def _round_up(x, a):
    return a * (-(-max(int(x), 1) // a))


def _choose_row_tiles(n_rows, requested, align):
    """Return (tile, n_tiles).

    Single full-array tile when the batch fits one requested tile (block dims then
    equal the array dims, so no (8,128) constraint and no forced split on 1-TC
    v5e/v6e).  Otherwise: near-equal `align`-aligned tiles, with an EVEN tile
    count so v7x's two TensorCores stay balanced on the 'parallel' row axis.
    """
    n_rows = int(n_rows)
    requested = _round_up(requested, align)
    if n_rows <= requested:
        return n_rows, 1
    n_tiles = -(-n_rows // requested)
    if n_tiles % 2:
        n_tiles += 1                              # even count -> 2-TC balance on v7x
    tile = _round_up(-(-n_rows // n_tiles), align)
    n_tiles = -(-n_rows // tile)
    return tile, n_tiles


# ----------------------------------------------------------------------------
# Primary Pallas kernel: fused gather + add + bias + ReLU
#   out[r] = relu(cat_tab[ids[0,r]] + lem_tab[ids[1,r]] + head_tab[ids[2,r]] + b)
# ----------------------------------------------------------------------------
def _gather_add_relu_kernel(ids_ref, cat_tab_ref, lem_tab_ref, head_tab_ref, b_ref, o_ref):
    cat_rows = jnp.take(cat_tab_ref[...], ids_ref[0], axis=0, mode="clip")
    lem_rows = jnp.take(lem_tab_ref[...], ids_ref[1], axis=0, mode="clip")
    head_rows = jnp.take(head_tab_ref[...], ids_ref[2], axis=0, mode="clip")
    acc = (cat_rows.astype(jnp.float32)
           + lem_rows.astype(jnp.float32)
           + head_rows.astype(jnp.float32)
           + b_ref[...])                                   # bias broadcast over rows
    o_ref[...] = jnp.maximum(acc, 0.0).astype(o_ref.dtype)


def _fused_gather_add_relu(ids, cat_tab, lem_tab, head_tab, b2, *, out_dtype, tile_rows):
    """relu(cat_tab[ids[0]] + lem_tab[ids[1]] + head_tab[ids[2]] + b) in one kernel.

    HBM traffic: 12 B/row of int32 ids in + the output rows out; the three folded
    tables and the bias stay VMEM-resident (constant index_map) for the whole grid.
    """
    n_rows = int(ids.shape[1])
    d_out = int(cat_tab.shape[1])

    tile, n_tiles = _choose_row_tiles(n_rows, tile_rows, align=128)
    n_pad = tile * n_tiles
    if n_pad != n_rows:
        # Pad ids with 0 (a valid row) so the last id block never holds garbage
        # indices; the matching output rows are masked by the partial output block.
        ids = jnp.pad(ids, ((0, 0), (0, n_pad - n_rows)))

    cost = pl.CostEstimate(
        flops=4 * n_rows * d_out,
        transcendentals=0,
        bytes_accessed=(ids.size * 4
                        + (cat_tab.size + lem_tab.size + head_tab.size + d_out) * 4
                        + n_rows * d_out * jnp.dtype(out_dtype).itemsize),
    )

    # NOTE: VMEM use here is tiny (resident tables + a (3, tile) id block + a
    # (tile, d_out) output block, double-buffered).  If rel_dim / tile_rows are
    # scaled way up, set pltpu.CompilerParams(vmem_limit_bytes=...) explicitly
    # (v7x's scoped default is 32 MiB of its 64 MiB physical VMEM).
    return pl.pallas_call(
        _gather_add_relu_kernel,
        out_shape=jax.ShapeDtypeStruct((n_rows, d_out), out_dtype),
        grid_spec=pltpu.PrefetchScalarGridSpec(
            num_scalar_prefetch=0,
            grid=(n_tiles,),
            in_specs=[
                pl.BlockSpec((3, tile), lambda i: (0, i)),       # id row tile
                pl.BlockSpec(cat_tab.shape, lambda i: (0, 0)),   # resident folded tables
                pl.BlockSpec(lem_tab.shape, lambda i: (0, 0)),
                pl.BlockSpec(head_tab.shape, lambda i: (0, 0)),
                pl.BlockSpec((1, d_out), lambda i: (0, 0)),      # bias
            ],
            out_specs=pl.BlockSpec((tile, d_out), lambda i: (i, 0)),
        ),
        compiler_params=pltpu.CompilerParams(dimension_semantics=("parallel",)),
        cost_estimate=cost,
    )(ids, cat_tab, lem_tab, head_tab, b2)


# ----------------------------------------------------------------------------
# Fallback Pallas kernel (previously proven path): XLA embedding gathers feed a
# fused 3-dot linear + bias + ReLU kernel with no concat intermediates.
# ----------------------------------------------------------------------------
def _linear_relu_kernel(cat_ref, lem_ref, head_ref, wc_ref, wl_ref, wh_ref, b_ref, o_ref):
    acc = jnp.dot(cat_ref[...], wc_ref[...], preferred_element_type=jnp.float32)
    acc = acc + jnp.dot(lem_ref[...], wl_ref[...], preferred_element_type=jnp.float32)
    acc = acc + jnp.dot(head_ref[...], wh_ref[...], preferred_element_type=jnp.float32)
    acc = acc + b_ref[...]
    o_ref[...] = jnp.maximum(acc, 0.0).astype(o_ref.dtype)


def _linear_relu_pallas(cat_e, lem_e, head_e, wc, wl, wh, b2, *, out_dtype, tile_rows):
    n_rows, d_cat = cat_e.shape
    d_lem = lem_e.shape[1]
    d_head = head_e.shape[1]
    d_out = wc.shape[1]
    tile, n_tiles = _choose_row_tiles(n_rows, tile_rows, align=8)
    return pl.pallas_call(
        _linear_relu_kernel,
        out_shape=jax.ShapeDtypeStruct((n_rows, d_out), out_dtype),
        grid_spec=pltpu.PrefetchScalarGridSpec(
            num_scalar_prefetch=0,
            grid=(n_tiles,),
            in_specs=[
                pl.BlockSpec((tile, d_cat), lambda i: (i, 0)),
                pl.BlockSpec((tile, d_lem), lambda i: (i, 0)),
                pl.BlockSpec((tile, d_head), lambda i: (i, 0)),
                pl.BlockSpec((d_cat, d_out), lambda i: (0, 0)),
                pl.BlockSpec((d_lem, d_out), lambda i: (0, 0)),
                pl.BlockSpec((d_head, d_out), lambda i: (0, 0)),
                pl.BlockSpec((1, d_out), lambda i: (0, 0)),
            ],
            out_specs=pl.BlockSpec((tile, d_out), lambda i: (i, 0)),
        ),
        compiler_params=pltpu.CompilerParams(dimension_semantics=("parallel",)),
    )(cat_e, lem_e, head_e, wc, wl, wh, b2)


# ----------------------------------------------------------------------------
# One-time capability probe: can Mosaic lower the in-kernel dynamic row gather?
# ----------------------------------------------------------------------------
_IN_KERNEL_GATHER_OK = None


def _in_kernel_gather_supported():
    global _IN_KERNEL_GATHER_OK
    if _IN_KERNEL_GATHER_OK is None:
        try:
            v, d, n = 200, 32, 256
            tab = (jnp.arange(v * d, dtype=jnp.float32).reshape(v, d) % 7.0) - 3.0
            ids = (jnp.arange(3 * n, dtype=jnp.int32).reshape(3, n) * 13) % v
            b2 = jnp.full((1, d), 0.25, jnp.float32)
            out = _fused_gather_add_relu(ids, tab, tab, tab, b2,
                                         out_dtype=jnp.float32, tile_rows=128)
            ref = jnp.maximum(tab[ids[0]] + tab[ids[1]] + tab[ids[2]] + b2, 0.0)
            _IN_KERNEL_GATHER_OK = bool(
                jnp.allclose(jax.block_until_ready(out), ref, atol=1e-5, rtol=1e-5))
        except Exception:
            _IN_KERNEL_GATHER_OK = False
    return _IN_KERNEL_GATHER_OK


# ----------------------------------------------------------------------------
# RootEncoder forward (glue in JAX, hot path in Pallas)
# ----------------------------------------------------------------------------
def root_encoder_forward(params, input_data, lengths, index_list, src_enc_list, *,
                         out_dtype=jnp.float32, tile_rows=4096, small_n_threshold=64):
    """
    input_data:   int32 [N_total, >=2] packed AMR node features (cols AMR_CAT, AMR_LE)
    lengths:      python list, per-sentence node counts (sum == N_total)
    index_list:   python list of int arrays, head indices into each sentence's src encoding
    src_enc_list: python list of float32 [L_i, rel_rnn_size] per-sentence encoder outputs
    returns (root_emb [N_total, rel_dim], lengths)   == MyPackedSequence(root_emb, lengths)
    """
    cat_ids = input_data[:, AMR_CAT].astype(jnp.int32)
    le_ids = input_data[:, AMR_LE].astype(jnp.int32)

    # getEmb: one global index vector into the concatenated src encoding
    # (per-sentence indices offset by cumulative, statically-known source lengths).
    src_all = jnp.concatenate(src_enc_list, axis=0)
    global_idx = []
    offset = 0
    for enc, idx in zip(src_enc_list, index_list):
        global_idx.append(jnp.asarray(idx, dtype=jnp.int32) + offset)
        offset += enc.shape[0]
    head_idx = jnp.concatenate(global_idx, axis=0)

    w = params["w_root"]
    b = params["b_root"]
    d_cat = params["cat_lut"].shape[1]
    d_lem = params["lemma_lut"].shape[1]
    wc, wl, wh = w[:d_cat], w[d_cat:d_cat + d_lem], w[d_cat + d_lem:]
    b2 = b.reshape(1, -1).astype(jnp.float32)

    # Fold the linear layer into the lookup tables (tiny trace-time matmuls):
    #   relu(cat_lut[c]@Wc + lemma_lut[l]@Wl + src_all[h]@Wh + b)
    # = relu((cat_lut@Wc)[c] + (lemma_lut@Wl)[l] + (src_all@Wh)[h] + b)
    cat_tab = params["cat_lut"] @ wc        # (V_cat, rel_dim)
    lem_tab = params["lemma_lut"] @ wl      # (V_lem, rel_dim)
    head_tab = src_all @ wh                 # (sum L_i, rel_dim)

    n_rows = int(cat_ids.shape[0])

    if n_rows <= small_n_threshold:
        # Tiny-N bypass: pallas_call overhead would dominate.  Uses the same
        # folded-table math as the kernel so numerics match across the threshold.
        y = cat_tab[cat_ids] + lem_tab[le_ids] + head_tab[head_idx] + b2
        return jnp.maximum(y, 0.0).astype(out_dtype), lengths

    ids = jnp.stack([cat_ids, le_ids, head_idx], axis=0)    # (3, N) int32

    if _in_kernel_gather_supported():
        try:
            root_emb = _fused_gather_add_relu(
                ids, cat_tab, lem_tab, head_tab, b2,
                out_dtype=out_dtype, tile_rows=tile_rows)
            return root_emb, lengths
        except Exception:
            pass    # fall through to the gather-free kernel below

    # Fallback: XLA gathers the embeddings, Pallas fuses the 3 dots + bias + ReLU.
    cat_e = jnp.take(params["cat_lut"], cat_ids, axis=0)
    lem_e = jnp.take(params["lemma_lut"], le_ids, axis=0)
    head_e = jnp.take(src_all, head_idx, axis=0)
    root_emb = _linear_relu_pallas(cat_e, lem_e, head_e, wc, wl, wh, b2,
                                   out_dtype=out_dtype, tile_rows=tile_rows)
    return root_emb, lengths


# ----------------------------------------------------------------------------
# Deterministic parameter init + example run + correctness checks
# ----------------------------------------------------------------------------
if __name__ == "__main__":
    key = jax.random.PRNGKey(0)

    # module hyperparameters (small, consistent with __init__)
    cat_vocab, cat_dim = 20, 8           # embs['cat_lut']
    lemma_vocab, lemma_dim = 30, 16      # embs['lemma_lut']
    rel_rnn_size = 8                     # opt.rel_rnn_size
    rel_dim = 32                         # opt.rel_dim  (self.size)
    input_size = cat_dim + lemma_dim + rel_rnn_size

    ks = jax.random.split(key, 8)
    params = {
        "cat_lut": jax.random.normal(ks[0], (cat_vocab, cat_dim), jnp.float32) * 0.1,
        "lemma_lut": jax.random.normal(ks[1], (lemma_vocab, lemma_dim), jnp.float32) * 0.1,
        "w_root": jax.random.normal(ks[2], (input_size, rel_dim), jnp.float32) * 0.1,
        "b_root": jax.random.normal(ks[3], (rel_dim,), jnp.float32) * 0.1,
    }

    def make_batch(bkey, lengths, src_lens):
        n_total = sum(lengths)
        kk = jax.random.split(bkey, 4)
        cat_ids = jax.random.randint(kk[0], (n_total,), 0, cat_vocab, dtype=jnp.int32)
        le_ids = jax.random.randint(kk[1], (n_total,), 0, lemma_vocab, dtype=jnp.int32)
        input_data = jnp.stack([cat_ids, le_ids], axis=1)
        src_keys = jax.random.split(kk[2], len(src_lens))
        src_enc_list = [jax.random.normal(k, (L, rel_rnn_size), jnp.float32)
                        for k, L in zip(src_keys, src_lens)]
        idx_keys = jax.random.split(kk[3], len(lengths))
        index_list = [jax.random.randint(k, (n,), 0, L, dtype=jnp.int32)
                      for k, n, L in zip(idx_keys, lengths, src_lens)]
        return input_data, index_list, src_enc_list

    def reference(input_data, index_list, src_enc_list):
        # pure-JAX reference mirroring the PyTorch forward exactly
        cat_e = params["cat_lut"][input_data[:, AMR_CAT]]
        lem_e = params["lemma_lut"][input_data[:, AMR_LE]]
        head_e = jnp.concatenate(
            [enc[idx] for enc, idx in zip(src_enc_list, index_list)], axis=0)
        ref_in = jnp.concatenate([cat_e, lem_e, head_e], axis=1)
        return jnp.maximum(ref_in @ params["w_root"] + params["b_root"], 0.0)

    # --- batch 1: small batch -> single full-array row tile ---
    lengths1 = [37, 45, 29, 53]                       # N_total = 164
    src_lens1 = [40, 50, 35, 60]
    inp1, idx1, enc1 = make_batch(ks[4], lengths1, src_lens1)
    out1, out_lengths1 = root_encoder_forward(params, inp1, lengths1, idx1, enc1)
    out1 = jax.block_until_ready(out1)
    ref1 = reference(inp1, idx1, enc1)
    assert out1.shape == (sum(lengths1), rel_dim)
    assert out_lengths1 == lengths1
    assert jnp.allclose(out1, ref1, atol=1e-4, rtol=1e-4)

    # --- batch 2: larger batch with a smaller requested tile -> balanced even
    # multi-tile grid, padded id stream, partial final output block ---
    lengths2 = [300, 320, 280, 350]                   # N_total = 1250
    src_lens2 = [310, 330, 290, 360]
    inp2, idx2, enc2 = make_batch(ks[5], lengths2, src_lens2)
    out2, _ = root_encoder_forward(params, inp2, lengths2, idx2, enc2, tile_rows=512)
    out2 = jax.block_until_ready(out2)
    ref2 = reference(inp2, idx2, enc2)
    assert out2.shape == (sum(lengths2), rel_dim)
    assert jnp.allclose(out2, ref2, atol=1e-4, rtol=1e-4)

    # --- bf16 output path (halves the dominant HBM stream when downstream allows) ---
    out1_bf16, _ = root_encoder_forward(params, inp1, lengths1, idx1, enc1,
                                        out_dtype=jnp.bfloat16)
    out1_bf16 = jax.block_until_ready(out1_bf16)
    assert jnp.allclose(out1_bf16.astype(jnp.float32), ref1, atol=2e-2, rtol=2e-2)

    print("KERNEL_OK")
</pallas_src>

<mosaic_0001>
module attributes {stable_mosaic.version = 11 : i64} {
  func.func @_linear_relu_kernel(%arg0: i32, %arg1: memref<164x8xf32, #tpu.memory_space<vmem>>, %arg2: memref<164x16xf32, #tpu.memory_space<vmem>>, %arg3: memref<164x8xf32, #tpu.memory_space<vmem>>, %arg4: memref<8x32xf32, #tpu.memory_space<vmem>>, %arg5: memref<16x32xf32, #tpu.memory_space<vmem>>, %arg6: memref<8x32xf32, #tpu.memory_space<vmem>>, %arg7: memref<1x32xf32, #tpu.memory_space<vmem>>, %arg8: memref<164x32xf32, #tpu.memory_space<vmem>>) attributes {dimension_semantics = [#tpu.dimension_semantics<parallel>], iteration_bounds = array<i64: 1>, scalar_prefetch = 0 : i64, scratch_operands = 0 : i64, tpu.core_type = #tpu.core_type<tc>, window_params = [{transform_indices = @transform_0, window_bounds = array<i64: 164, 8>}, {transform_indices = @transform_1, window_bounds = array<i64: 164, 16>}, {transform_indices = @transform_2, window_bounds = array<i64: 164, 8>}, {pipeline_mode = #tpu.pipeline_mode<synchronous>, transform_indices = @transform_3, window_bounds = array<i64: 8, 32>}, {pipeline_mode = #tpu.pipeline_mode<synchronous>, transform_indices = @transform_4, window_bounds = array<i64: 16, 32>}, {pipeline_mode = #tpu.pipeline_mode<synchronous>, transform_indices = @transform_5, window_bounds = array<i64: 8, 32>}, {pipeline_mode = #tpu.pipeline_mode<synchronous>, transform_indices = @transform_6, window_bounds = array<i64: 1, 32>}, {transform_indices = @transform_7, window_bounds = array<i64: 164, 32>}]} {
    %c0 = arith.constant 0 : index
    %c0_0 = arith.constant 0 : index
    %0 = vector.load %arg1[%c0, %c0_0] : memref<164x8xf32, #tpu.memory_space<vmem>>, vector<164x8xf32>
    %c0_1 = arith.constant 0 : index
    %c0_2 = arith.constant 0 : index
    %1 = vector.load %arg4[%c0_1, %c0_2] : memref<8x32xf32, #tpu.memory_space<vmem>>, vector<8x32xf32>
    %cst = arith.constant dense<0.000000e+00> : vector<164x32xf32>
    %2 = tpu.matmul %0, %1, %cst {dimension_numbers = #tpu.dot_dimension_numbers<[1], [0], [0], [1], [0, 0, 1, 1], [], []>} : vector<164x8xf32>, vector<8x32xf32>, vector<164x32xf32> -> vector<164x32xf32>
    %c0_3 = arith.constant 0 : index
    %c0_4 = arith.constant 0 : index
    %3 = vector.load %arg2[%c0_3, %c0_4] : memref<164x16xf32, #tpu.memory_space<vmem>>, vector<164x16xf32>
    %c0_5 = arith.constant 0 : index
    %c0_6 = arith.constant 0 : index
    %4 = vector.load %arg5[%c0_5, %c0_6] : memref<16x32xf32, #tpu.memory_space<vmem>>, vector<16x32xf32>
    %cst_7 = arith.constant dense<0.000000e+00> : vector<164x32xf32>
    %5 = tpu.matmul %3, %4, %cst_7 {dimension_numbers = #tpu.dot_dimension_numbers<[1], [0], [0], [1], [0, 0, 1, 1], [], []>} : vector<164x16xf32>, vector<16x32xf32>, vector<164x32xf32> -> vector<164x32xf32>
    %6 = arith.addf %2, %5 : vector<164x32xf32>
    %c0_8 = arith.constant 0 : index
    %c0_9 = arith.constant 0 : index
    %7 = vector.load %arg3[%c0_8, %c0_9] : memref<164x8xf32, #tpu.memory_space<vmem>>, vector<164x8xf32>
    %c0_10 = arith.constant 0 : index
    %c0_11 = arith.constant 0 : index
    %8 = vector.load %arg6[%c0_10, %c0_11] : memref<8x32xf32, #tpu.memory_space<vmem>>, vector<8x32xf32>
    %cst_12 = arith.constant dense<0.000000e+00> : vector<164x32xf32>
    %9 = tpu.matmul %7, %8, %cst_12 {dimension_numbers = #tpu.dot_dimension_numbers<[1], [0], [0], [1], [0, 0, 1, 1], [], []>} : vector<164x8xf32>, vector<8x32xf32>, vector<164x32xf32> -> vector<164x32xf32>
    %10 = arith.addf %6, %9 : vector<164x32xf32>
    %c0_13 = arith.constant 0 : index
    %c0_14 = arith.constant 0 : index
    %11 = vector.load %arg7[%c0_13, %c0_14] : memref<1x32xf32, #tpu.memory_space<vmem>>, vector<1x32xf32>
    %12 = vector.broadcast %11 : vector<1x32xf32> to vector<164x32xf32>
    %13 = arith.addf %10, %12 : vector<164x32xf32>
    %cst_15 = arith.constant 0.000000e+00 : f32
    %14 = vector.broadcast %cst_15 : f32 to vector<164x32xf32>
    %15 = arith.maximumf %13, %14 : vector<164x32xf32>
    %c0_16 = arith.constant 0 : index
    %c0_17 = arith.constant 0 : index
    %16 = vector.load %arg8[%c0_16, %c0_17] : memref<164x32xf32, #tpu.memory_space<vmem>>, vector<164x32xf32>
    tpu.vector_store %arg8[%c0_16, %c0_17], %15 {strides = array<i32>} : memref<164x32xf32, #tpu.memory_space<vmem>>, vector<164x32xf32>,
    return
  }
  func.func @transform_0(%arg0: i32) -> (i32, i32) {
    %c0_i32 = arith.constant 0 : i32
    %c0_i32_0 = arith.constant 0 : i32
    return %arg0, %c0_i32 : i32, i32
  }
  func.func @transform_1(%arg0: i32) -> (i32, i32) {
    %c0_i32 = arith.constant 0 : i32
    %c0_i32_0 = arith.constant 0 : i32
    return %arg0, %c0_i32 : i32, i32
  }
  func.func @transform_2(%arg0: i32) -> (i32, i32) {
    %c0_i32 = arith.constant 0 : i32
    %c0_i32_0 = arith.constant 0 : i32
    return %arg0, %c0_i32 : i32, i32
  }
  func.func @transform_3(%arg0: i32) -> (i32, i32) {
    %c0_i32 = arith.constant 0 : i32
    %c0_i32_0 = arith.constant 0 : i32
    %c0_i32_1 = arith.constant 0 : i32
    return %c0_i32, %c0_i32_0 : i32, i32
  }
  func.func @transform_4(%arg0: i32) -> (i32, i32) {
    %c0_i32 = arith.constant 0 : i32
    %c0_i32_0 = arith.constant 0 : i32
    %c0_i32_1 = arith.constant 0 : i32
    return %c0_i32, %c0_i32_0 : i32, i32
  }
  func.func @transform_5(%arg0: i32) -> (i32, i32) {
    %c0_i32 = arith.constant 0 : i32
    %c0_i32_0 = arith.constant 0 : i32
    %c0_i32_1 = arith.constant 0 : i32
    return %c0_i32, %c0_i32_0 : i32, i32
  }
  func.func @transform_6(%arg0: i32) -> (i32, i32) {
    %c0_i32 = arith.constant 0 : i32
    %c0_i32_0 = arith.constant 0 : i32
    %c0_i32_1 = arith.constant 0 : i32
    return %c0_i32, %c0_i32_0 : i32, i32
  }
  func.func @transform_7(%arg0: i32) -> (i32, i32) {
    %c0_i32 = arith.constant 0 : i32
    %c0_i32_0 = arith.constant 0 : i32
    return %arg0, %c0_i32 : i32, i32
  }
}

</mosaic_0001>

<bundles_post_ra>
// kernel: tpu_custom_call.1
= control target key start
LH: loop header
LB: loop body
LE: loop exit
PB: predicated region body
PF: predicated region fallthrough
CT: control target
= control target key end

     0   :  { %v1223_v0 = vmov 0.0   ;;  %vm305_vm0 = vcmask 64512   ;;  %vm1224_vm1 = vmmov 0   ;;  %vm71_vm2 = vcmask 130048   ;;  %s1883_s4 = inlined_call_operand.vmem [shape: f32[16,32], index: 4, kind: input, shape index: {}]   ;;  %s1884_s3 = inlined_call_operand.vmem [shape: f32[8,32], index: 3, kind: input, shape index: {}]   ;;  %s1885_s0 = inlined_call_operand.vmem [shape: f32[164,8], index: 0, kind: input, shape index: {}]   ;;  %s1886_s5 = inlined_call_operand.vmem [shape: f32[8,32], index: 5, kind: input, shape index: {}]   ;;  %s1887_s1 = inlined_call_operand.vmem [shape: f32[164,16], index: 1, kind: input, shape index: {}]   ;;  %s1888_s2 = inlined_call_operand.vmem [shape: f32[164,8], index: 2, kind: input, shape index: {}]   ;;  %s1889_s6 = inlined_call_operand.vmem [shape: f32[1,32], index: 6, kind: input, shape index: {}]   ;;  %s1890_s7 = inlined_call_operand.vmem [shape: f32[164,32], index: 7, kind: output, shape index: {}]  }
   0x1   :  { %1022 = vmatprep.subr.mxu0 %v1223_v0  ;;  %1219 = vmatprep.subr.mxu1 %v1223_v0  ;;  %v70_v1 = vld [vmem:[%s1883_s4 + $0x8] sm:$0xff]  ;;  %v47_v2 = vld [vmem:[%s1884_s3] sm:$0xff]  ;;  %v36_v3 = vld [vmem:[%s1885_s0 + $0x50] sm:$0xff]  ;;  %vm864_vm3 = vcmask 261120   ;;  %vm885_vm4 = vcmask 257024  }
   0x2   :  { %1023 = vmatpush3.msra.mxu0 %v70_v1  ;;  %1220 = vmatpush3.msra.mxu1 %v47_v2  ;;  %v69_v4 = vld [vmem:[%s1883_s4] sm:$0xff]  ;;  %v37_v7 = vld [vmem:[%s1885_s0 + $0x58] sm:$0xff]  ;;  %v49_v8 = vld [vmem:[%s1887_s1 + $0x8] sm:$0xff] }
   0x3   :  { %1121 = vmatprep.mubr.msk.f32.mxu1 %vm1224_vm1, %v1223_v0  ;;  %1024 = vmatprep.subr.mxu0 %v1223_v0  ;;  %v560_v5 = vld [vmem:[%s1886_s5] sm:$0xff]  ;;  %v50_v10 = vld [vmem:[%s1887_s1 + $0x10] sm:$0xff]  ;;  %v39_v11 = vld [vmem:[%s1885_s0 + $0x68] sm:$0xff] }
   0x4   :  { %v48_v6 = vld [vmem:[%s1887_s1] sm:$0xff]  ;;  %1122 = vmatmul.mubr.msk.f32.vlgmr.msra.gmra.mxu1 %vm305_vm0, %v36_v3  ;;  %1154 = vmatprep.subr.mxu1 %v1223_v0  ;;  %v51_v12 = vld [vmem:[%s1887_s1 + $0x18] sm:$0xff]  ;;  %v40_v13 = vld [vmem:[%s1885_s0 + $0x70] sm:$0xff] }
   0x5   :  { %1025 = vmatpush3.msra.mxu0 %v69_v4  ;;  %1026 = vmatprep.mubr.msk.f32.mxu0 %vm1224_vm1, %v1223_v0  ;;  %v38_v9 = vld [vmem:[%s1885_s0 + $0x60] sm:$0xff]  ;;  %v41_v15 = vld [vmem:[%s1885_s0 + $0x78] sm:$0xff]  ;;  %v53_v16 = vld [vmem:[%s1887_s1 + $0x28] sm:$0xff] }
   0x6   :  { %1155 = vmatpush3.msra.mxu1 %v560_v5  ;;  %1027 = vmatmul.mubr.msk.f32.vlgmr.msra.gmra.mxu0 %vm71_vm2, %v48_v6  ;;  %v52_v14 = vld [vmem:[%s1887_s1 + $0x20] sm:$0xff]  ;;  %v54_v18 = vld [vmem:[%s1887_s1 + $0x30] sm:$0xff]  ;;  %v43_v19 = vld [vmem:[%s1885_s0 + $0x88] sm:$0xff] }
   0x7   :  { %1089 = vmatprep.subr.mxu0 %v1223_v0  ;;  %1124 = vmatprep.mubr.msk.f32.mxu1 %vm1224_vm1, %v1223_v0  ;;  %v42_v17 = vld [vmem:[%s1885_s0 + $0x80] sm:$0xff]  ;;  %v55_v20 = vld [vmem:[%s1887_s1 + $0x38] sm:$0xff]  ;;  %v44_v21 = vld [vmem:[%s1885_s0 + $0x90] sm:$0xff] }
   0x8   :  { %1090 = vmatpush3.msra.mxu0 %v47_v2  ;;  %1125 = vmatmul.mubr.msk.f32.gmra.mxu1 %vm305_vm0, %v37_v7  ;;  %v56_v22 = vld [vmem:[%s1887_s1 + $0x40] sm:$0xff]  ;;  %v45_v23 = vld [vmem:[%s1885_s0 + $0x98] sm:$0xff]  ;;  %v57_v24 = vld [vmem:[%s1887_s1 + $0x48] sm:$0xff] }
   0x9   :  { %1029 = vmatprep.mubr.msk.f32.mxu0 %vm1224_vm1, %v1223_v0  ;;  %1127 = vmatprep.mubr.msk.f32.mxu1 %vm1224_vm1, %v1223_v0  ;;  %v46_v25 = vld [vmem:[%s1885_s0 + $0xa0] sm:$0xf]  ;;  %v58_v26 = vld [vmem:[%s1887_s1 + $0x50] sm:$0xff]  ;;  %v59_v28 = vld [vmem:[%s1887_s1 + $0x58] sm:$0xff] }
   0xa   :  { %1030 = vmatmul.mubr.msk.f32.gmra.mxu0 %vm71_vm2, %v49_v8  ;;  %v539_v27 = vld [vmem:[%s1888_s2] sm:$0xff]  ;;  %v540_v29 = vld [vmem:[%s1888_s2 + $0x8] sm:$0xff]  ;;  %v541_v31 = vld [vmem:[%s1888_s2 + $0x10] sm:$0xff] }
   0xb   :  { %1032 = vmatprep.mubr.msk.f32.mxu0 %vm1224_vm1, %v1223_v0  ;;  %v60_v30 = vld [vmem:[%s1887_s1 + $0x60] sm:$0xff]  ;;  %v61_v32 = vld [vmem:[%s1887_s1 + $0x68] sm:$0xff]  ;;  %v542_v33 = vld [vmem:[%s1888_s2 + $0x18] sm:$0xff] }
   0xc   :  { %1128 = vmatmul.mubr.msk.f32.gmra.mxu1 %vm305_vm0, %v38_v9  ;;  %v62_v34 = vld [vmem:[%s1887_s1 + $0x70] sm:$0xff]  ;;  %v543_v35 = vld [vmem:[%s1888_s2 + $0x20] sm:$0xff]  ;;  %v63_v36 = vld [vmem:[%s1887_s1 + $0x78] sm:$0xff] }
   0xd   :  { %1130 = vmatprep.mubr.msk.f32.mxu1 %vm1224_vm1, %v1223_v0  ;;  %v544_v37 = vld [vmem:[%s1888_s2 + $0x28] sm:$0xff]  ;;  %v64_v38 = vld [vmem:[%s1887_s1 + $0x80] sm:$0xff]  ;;  %v545_v39 = vld [vmem:[%s1888_s2 + $0x30] sm:$0xff] }
   0xe   :  { %1033 = vmatmul.mubr.msk.f32.gmra.mxu0 %vm71_vm2, %v50_v10  ;;  %v65_v40 = vld [vmem:[%s1887_s1 + $0x88] sm:$0xff]  ;;  %v546_v41 = vld [vmem:[%s1888_s2 + $0x38] sm:$0xff]  ;;  %v66_v42 = vld [vmem:[%s1887_s1 + $0x90] sm:$0xff] }
   0xf   :  { %1035 = vmatprep.mubr.msk.f32.mxu0 %vm1224_vm1, %v1223_v0  ;;  %v547_v43 = vld [vmem:[%s1888_s2 + $0x40] sm:$0xff]  ;;  %v67_v44 = vld [vmem:[%s1887_s1 + $0x98] sm:$0xff]  ;;  %v548_v45 = vld [vmem:[%s1888_s2 + $0x48] sm:$0xff] }
  0x10   :  { %1131 = vmatmul.mubr.msk.f32.gmra.mxu1 %vm305_vm0, %v39_v11  ;;  %v68_v46 = vld [vmem:[%s1887_s1 + $0xa0] sm:$0xf]  ;;  %v549_v47 = vld [vmem:[%s1888_s2 + $0x50] sm:$0xff]  ;;  %v550_v49 = vld [vmem:[%s1888_s2 + $0x58] sm:$0xff] }
  0x11   :  { %1133 = vmatprep.mubr.msk.f32.mxu1 %vm1224_vm1, %v1223_v0  ;;  %v26_v48 = vld [vmem:[%s1885_s0] sm:$0xff]  ;;  %v27_v50 = vld [vmem:[%s1885_s0 + $0x8] sm:$0xff]  ;;  %v28_v52 = vld [vmem:[%s1885_s0 + $0x10] sm:$0xff] }
  0x12   :  { %1036 = vmatmul.mubr.msk.f32.gmra.mxu0 %vm71_vm2, %v51_v12  ;;  %v551_v51 = vld [vmem:[%s1888_s2 + $0x60] sm:$0xff]  ;;  %v552_v53 = vld [vmem:[%s1888_s2 + $0x68] sm:$0xff]  ;;  %v29_v54 = vld [vmem:[%s1885_s0 + $0x18] sm:$0xff] }
  0x13   :  { %1038 = vmatprep.mubr.msk.f32.mxu0 %vm1224_vm1, %v1223_v0  ;;  %v553_v55 = vld [vmem:[%s1888_s2 + $0x70] sm:$0xff]  ;;  %v30_v56 = vld [vmem:[%s1885_s0 + $0x20] sm:$0xff]  ;;  %v554_v57 = vld [vmem:[%s1888_s2 + $0x78] sm:$0xff] }
  0x14   :  { %1134 = vmatmul.mubr.msk.f32.gmra.mxu1 %vm305_vm0, %v40_v13  ;;  %v31_v58 = vld [vmem:[%s1885_s0 + $0x28] sm:$0xff]  ;;  %v555_v59 = vld [vmem:[%s1888_s2 + $0x80] sm:$0xff]  ;;  %v32_v60 = vld [vmem:[%s1885_s0 + $0x30] sm:$0xff] }
  0x15   :  { %1136 = vmatprep.mubr.msk.f32.mxu1 %vm1224_vm1, %v1223_v0  ;;  %v556_v61 = vld [vmem:[%s1888_s2 + $0x88] sm:$0xff]  ;;  %v33_v62 = vld [vmem:[%s1885_s0 + $0x38] sm:$0xff]  ;;  %v557_v63 = vld [vmem:[%s1888_s2 + $0x90] sm:$0xff] }
  0x16   :  { %1039 = vmatmul.mubr.msk.f32.gmra.mxu0 %vm71_vm2, %v52_v14  ;;  %v34_v1 = vld [vmem:[%s1885_s0 + $0x40] sm:$0xff]  ;;  %v558_v2 = vld [vmem:[%s1888_s2 + $0x98] sm:$0xff]  ;;  %v35_v3 = vld [vmem:[%s1885_s0 + $0x48] sm:$0xff] }
  0x17   :  { %1041 = vmatprep.mubr.msk.f32.mxu0 %vm1224_vm1, %v1223_v0  ;;  %v559_v4 = vld [vmem:[%s1888_s2 + $0xa0] sm:$0xf] }
  0x18   :  { %1137 = vmatmul.mubr.msk.f32.gmra.mxu1 %vm305_vm0, %v41_v15 }
  0x19   :  { %1139 = vmatprep.mubr.msk.f32.mxu1 %vm1224_vm1, %v1223_v0 }
  0x1a   :  { %1042 = vmatmul.mubr.msk.f32.gmra.mxu0 %vm71_vm2, %v53_v16 }
  0x1b   :  { %1044 = vmatprep.mubr.msk.f32.mxu0 %vm1224_vm1, %v1223_v0 }
  0x1c   :  { %1140 = vmatmul.mubr.msk.f32.gmra.mxu1 %vm305_vm0, %v42_v17 }
  0x1d   :  { %1142 = vmatprep.mubr.msk.f32.mxu1 %vm1224_vm1, %v1223_v0 }
  0x1e   :  { %1045 = vmatmul.mubr.msk.f32.gmra.mxu0 %vm71_vm2, %v54_v18 }
  0x1f   :  { %1047 = vmatprep.mubr.msk.f32.mxu0 %vm1224_vm1, %v1223_v0 }
  0x20   :  { %1143 = vmatmul.mubr.msk.f32.gmra.mxu1 %vm305_vm0, %v43_v19 }
  0x21   :  { %1145 = vmatprep.mubr.msk.f32.mxu1 %vm1224_vm1, %v1223_v0 }
  0x22   :  { %1048 = vmatmul.mubr.msk.f32.gmra.mxu0 %vm71_vm2, %v55_v20 }
  0x23   :  { %1050 = vmatprep.mubr.msk.f32.mxu0 %vm1224_vm1, %v1223_v0 }
  0x24   :  { %1146 = vmatmul.mubr.msk.f32.gmra.mxu1 %vm305_vm0, %v44_v21 }
  0x25   :  { %1148 = vmatprep.mubr.msk.f32.mxu1 %vm1224_vm1, %v1223_v0 }
  0x26   :  { %1051 = vmatmul.mubr.msk.f32.gmra.mxu0 %vm71_vm2, %v56_v22 }
  0x27   :  { %1053 = vmatprep.mubr.msk.f32.mxu0 %vm1224_vm1, %v1223_v0 }
  0x28   :  { %1149 = vmatmul.mubr.msk.f32.gmra.mxu1 %vm305_vm0, %v45_v23 }
  0x29   :  { %1151 = vmatprep.mubr.msk.f32.mxu1 %vm1224_vm1, %v1223_v0 }
  0x2a   :  { %1054 = vmatmul.mubr.msk.f32.gmra.mxu0 %vm71_vm2, %v57_v24 }
  0x2b   :  { %1056 = vmatprep.mubr.msk.f32.mxu0 %vm1224_vm1, %v1223_v0 }
  0x2c   :  { %1152 = vmatmul.mubr.msk.f32.gmra.mxu1 %vm305_vm0, %v46_v25 }
  0x2d   :  { %1156 = vmatprep.mubr.msk.f32.mxu1 %vm1224_vm1, %v1223_v0 }
  0x2e   :  { %1057 = vmatmul.mubr.msk.f32.gmra.mxu0 %vm71_vm2, %v58_v26 }
  0x2f   :  { %1059 = vmatprep.mubr.msk.f32.mxu0 %vm1224_vm1, %v1223_v0 }
  0x30   :  { %1157 = vmatmul.mubr.msk.f32.vlgmr.msra.gmra.mxu1 %vm305_vm0, %v539_v27 }
  0x31   :  { %1159 = vmatprep.mubr.msk.f32.mxu1 %vm1224_vm1, %v1223_v0 }
  0x32   :  { %1060 = vmatmul.mubr.msk.f32.gmra.mxu0 %vm71_vm2, %v59_v28 }
  0x33   :  { %1062 = vmatprep.mubr.msk.f32.mxu0 %vm1224_vm1, %v1223_v0 }
  0x34   :  { %1160 = vmatmul.mubr.msk.f32.gmra.mxu1 %vm305_vm0, %v540_v29 }
  0x35   :  { %1162 = vmatprep.mubr.msk.f32.mxu1 %vm1224_vm1, %v1223_v0 }
  0x36   :  { %1063 = vmatmul.mubr.msk.f32.gmra.mxu0 %vm71_vm2, %v60_v30 }
  0x37   :  { %1065 = vmatprep.mubr.msk.f32.mxu0 %vm1224_vm1, %v1223_v0 }
  0x38   :  { %1163 = vmatmul.mubr.msk.f32.gmra.mxu1 %vm305_vm0, %v541_v31 }
  0x39   :  { %1165 = vmatprep.mubr.msk.f32.mxu1 %vm1224_vm1, %v1223_v0 }
  0x3a   :  { %1066 = vmatmul.mubr.msk.f32.gmra.mxu0 %vm71_vm2, %v61_v32 }
  0x3b   :  { %1068 = vmatprep.mubr.msk.f32.mxu0 %vm1224_vm1, %v1223_v0 }
  0x3c   :  { %1166 = vmatmul.mubr.msk.f32.gmra.mxu1 %vm305_vm0, %v542_v33 }
  0x3d   :  { %1168 = vmatprep.mubr.msk.f32.mxu1 %vm1224_vm1, %v1223_v0 }
  0x3e   :  { %1069 = vmatmul.mubr.msk.f32.gmra.mxu0 %vm71_vm2, %v62_v34 }
  0x3f   :  { %1071 = vmatprep.mubr.msk.f32.mxu0 %vm1224_vm1, %v1223_v0 }
  0x40   :  { %1169 = vmatmul.mubr.msk.f32.gmra.mxu1 %vm305_vm0, %v543_v35 }
  0x41   :  { %1171 = vmatprep.mubr.msk.f32.mxu1 %vm1224_vm1, %v1223_v0 }
  0x42   :  { %1072 = vmatmul.mubr.msk.f32.gmra.mxu0 %vm71_vm2, %v63_v36 }
  0x43   :  { %1074 = vmatprep.mubr.msk.f32.mxu0 %vm1224_vm1, %v1223_v0 }
  0x44   :  { %1172 = vmatmul.mubr.msk.f32.gmra.mxu1 %vm305_vm0, %v544_v37 }
  0x45   :  { %1174 = vmatprep.mubr.msk.f32.mxu1 %vm1224_vm1, %v1223_v0 }
  0x46   :  { %1075 = vmatmul.mubr.msk.f32.gmra.mxu0 %vm71_vm2, %v64_v38 }
  0x47   :  { %1077 = vmatprep.mubr.msk.f32.mxu0 %vm1224_vm1, %v1223_v0 }
  0x48   :  { %1175 = vmatmul.mubr.msk.f32.gmra.mxu1 %vm305_vm0, %v545_v39 }
  0x49   :  { %1177 = vmatprep.mubr.msk.f32.mxu1 %vm1224_vm1, %v1223_v0 }
  0x4a   :  { %1078 = vmatmul.mubr.msk.f32.gmra.mxu0 %vm71_vm2, %v65_v40 }
  0x4b   :  { %1080 = vmatprep.mubr.msk.f32.mxu0 %vm1224_vm1, %v1223_v0 }
  0x4c   :  { %1178 = vmatmul.mubr.msk.f32.gmra.mxu1 %vm305_vm0, %v546_v41 }
  0x4d   :  { %1180 = vmatprep.mubr.msk.f32.mxu1 %vm1224_vm1, %v1223_v0 }
  0x4e   :  { %1081 = vmatmul.mubr.msk.f32.gmra.mxu0 %vm71_vm2, %v66_v42 }
  0x4f   :  { %1083 = vmatprep.mubr.msk.f32.mxu0 %vm1224_vm1, %v1223_v0 }
  0x50   :  { %1181 = vmatmul.mubr.msk.f32.gmra.mxu1 %vm305_vm0, %v547_v43 }
  0x51   :  { %1183 = vmatprep.mubr.msk.f32.mxu1 %vm1224_vm1, %v1223_v0 }
  0x52   :  { %1084 = vmatmul.mubr.msk.f32.gmra.mxu0 %vm71_vm2, %v67_v44 }
  0x53   :  { %1086 = vmatprep.mubr.msk.f32.mxu0 %vm1224_vm1, %v1223_v0 }
  0x54   :  { %1184 = vmatmul.mubr.msk.f32.gmra.mxu1 %vm305_vm0, %v548_v45 }
  0x55   :  { %1186 = vmatprep.mubr.msk.f32.mxu1 %vm1224_vm1, %v1223_v0 }
  0x56   :  { %1087 = vmatmul.mubr.msk.f32.gmra.mxu0 %vm71_vm2, %v68_v46 }
  0x57   :  { %1091 = vmatprep.mubr.msk.f32.mxu0 %vm1224_vm1, %v1223_v0 }
  0x58   :  { %1187 = vmatmul.mubr.msk.f32.gmra.mxu1 %vm305_vm0, %v549_v47 }
  0x59   :  { %1189 = vmatprep.mubr.msk.f32.mxu1 %vm1224_vm1, %v1223_v0 }
  0x5a   :  { %1092 = vmatmul.mubr.msk.f32.vlgmr.msra.gmra.mxu0 %vm305_vm0, %v26_v48 }
  0x5b   :  { %1094 = vmatprep.mubr.msk.f32.mxu0 %vm1224_vm1, %v1223_v0 }
  0x5c   :  { %1190 = vmatmul.mubr.msk.f32.gmra.mxu1 %vm305_vm0, %v550_v49 }
  0x5d   :  { %1192 = vmatprep.mubr.msk.f32.mxu1 %vm1224_vm1, %v1223_v0 }
  0x5e   :  { %1095 = vmatmul.mubr.msk.f32.gmra.mxu0 %vm305_vm0, %v27_v50 }
  0x5f   :  { %1097 = vmatprep.mubr.msk.f32.mxu0 %vm1224_vm1, %v1223_v0 }
  0x60   :  { %1193 = vmatmul.mubr.msk.f32.gmra.mxu1 %vm305_vm0, %v551_v51 }
  0x61   :  { %1195 = vmatprep.mubr.msk.f32.mxu1 %vm1224_vm1, %v1223_v0 }
  0x62   :  { %1098 = vmatmul.mubr.msk.f32.gmra.mxu0 %vm305_vm0, %v28_v52 }
  0x63   :  { %1100 = vmatprep.mubr.msk.f32.mxu0 %vm1224_vm1, %v1223_v0 }
  0x64   :  { %1196 = vmatmul.mubr.msk.f32.gmra.mxu1 %vm305_vm0, %v552_v53 }
  0x65   :  { %1198 = vmatprep.mubr.msk.f32.mxu1 %vm1224_vm1, %v1223_v0 }
  0x66   :  { %1101 = vmatmul.mubr.msk.f32.gmra.mxu0 %vm305_vm0, %v29_v54 }
  0x67   :  { %1103 = vmatprep.mubr.msk.f32.mxu0 %vm1224_vm1, %v1223_v0 }
  0x68   :  { %1199 = vmatmul.mubr.msk.f32.gmra.mxu1 %vm305_vm0, %v553_v55 }
  0x69   :  { %1201 = vmatprep.mubr.msk.f32.mxu1 %vm1224_vm1, %v1223_v0 }
  0x6a   :  { %1104 = vmatmul.mubr.msk.f32.gmra.mxu0 %vm305_vm0, %v30_v56 }
  0x6b   :  { %1106 = vmatprep.mubr.msk.f32.mxu0 %vm1224_vm1, %v1223_v0 }
  0x6c   :  { %1202 = vmatmul.mubr.msk.f32.gmra.mxu1 %vm305_vm0, %v554_v57 }
  0x6d   :  { %1204 = vmatprep.mubr.msk.f32.mxu1 %vm1224_vm1, %v1223_v0 }
  0x6e   :  { %1107 = vmatmul.mubr.msk.f32.gmra.mxu0 %vm305_vm0, %v31_v58 }
  0x6f   :  { %1109 = vmatprep.mubr.msk.f32.mxu0 %vm1224_vm1, %v1223_v0 }
  0x70   :  { %1205 = vmatmul.mubr.msk.f32.gmra.mxu1 %vm305_vm0, %v555_v59 }
  0x71   :  { %1207 = vmatprep.mubr.msk.f32.mxu1 %vm1224_vm1, %v1223_v0 }
  0x72   :  { %1110 = vmatmul.mubr.msk.f32.gmra.mxu0 %vm305_vm0, %v32_v60 }
  0x73   :  { %1112 = vmatprep.mubr.msk.f32.mxu0 %vm1224_vm1, %v1223_v0 }
  0x74   :  { %1208 = vmatmul.mubr.msk.f32.gmra.mxu1 %vm305_vm0, %v556_v61 }
  0x75   :  { %1210 = vmatprep.mubr.msk.f32.mxu1 %vm1224_vm1, %v1223_v0 }
  0x76   :  { %1113 = vmatmul.mubr.msk.f32.gmra.mxu0 %vm305_vm0, %v33_v62 }
  0x77   :  { %1115 = vmatprep.mubr.msk.f32.mxu0 %vm1224_vm1, %v1223_v0 }
  0x78   :  { %1211 = vmatmul.mubr.msk.f32.gmra.mxu1 %vm305_vm0, %v557_v63 }
  0x79   :  { %1213 = vmatprep.mubr.msk.f32.mxu1 %vm1224_vm1, %v1223_v0 }
  0x7a   :  { %1116 = vmatmul.mubr.msk.f32.gmra.mxu0 %vm305_vm0, %v34_v1 }
  0x7b   :  { %1118 = vmatprep.mubr.msk.f32.mxu0 %vm1224_vm1, %v1223_v0 }
  0x7c   :  { %1214 = vmatmul.mubr.msk.f32.gmra.mxu1 %vm305_vm0, %v558_v2 }
  0x7d   :  { %1216 = vmatprep.mubr.msk.f32.mxu1 %vm1224_vm1, %v1223_v0 }
  0x7e   :  { %1119 = vmatmul.mubr.msk.f32.gmra.mxu0 %vm305_vm0, %v35_v3 }
  0x80   :  { %1217 = vmatmul.mubr.msk.f32.gmra.mxu1 %vm305_vm0, %v559_v4 }
  0xc4   :  { %v1660_v5 = vpop.f32.mrf.mxu1 }
  0xc6   :  { %v1662_v6 = vpop.f32.mrf.mxu0  ;;  %v1123_v7 = vpop.f32.mrf.mxu1 }
  0xc8   :  { %v1028_v8 = vpop.f32.mrf.mxu0  ;;  %v1664_v9 = vpop.f32.mrf.mxu1 }
  0xca   :  { %v1666_v10 = vpop.f32.mrf.mxu0  ;;  %v1126_v11 = vpop.f32.mrf.mxu1 }
  0xcc   :  { %v1031_v0 = vpop.f32.mrf.mxu0  ;;  %v1668_v12 = vpop.f32.mrf.mxu1 }
  0xce   :  { %v1670_v13 = vpop.f32.mrf.mxu0  ;;  %v1129_v14 = vpop.f32.mrf.mxu1 }
  0xd0   :  { %v1034_v15 = vpop.f32.mrf.mxu0  ;;  %v1672_v16 = vpop.f32.mrf.mxu1 }
  0xd2   :  { %v1674_v17 = vpop.f32.mrf.mxu0  ;;  %v1132_v18 = vpop.f32.mrf.mxu1 }
  0xd4   :  { %v1037_v19 = vpop.f32.mrf.mxu0  ;;  %v1676_v20 = vpop.f32.mrf.mxu1 }
  0xd6   :  { %v1678_v21 = vpop.f32.mrf.mxu0  ;;  %v1135_v22 = vpop.f32.mrf.mxu1 }
  0xd8   :  { %v1040_v23 = vpop.f32.mrf.mxu0  ;;  %v1680_v24 = vpop.f32.mrf.mxu1 }
  0xda   :  { %v1682_v25 = vpop.f32.mrf.mxu0  ;;  %v1138_v26 = vpop.f32.mrf.mxu1 }
  0xdc   :  { %v1043_v27 = vpop.f32.mrf.mxu0  ;;  %v1684_v28 = vpop.f32.mrf.mxu1 }
  0xde   :  { %v1686_v29 = vpop.f32.mrf.mxu0  ;;  %v1141_v30 = vpop.f32.mrf.mxu1 }
  0xe0   :  { %v1046_v31 = vpop.f32.mrf.mxu0  ;;  %v1688_v32 = vpop.f32.mrf.mxu1 }
  0xe2   :  { %v1690_v33 = vpop.f32.mrf.mxu0  ;;  %v1144_v34 = vpop.f32.mrf.mxu1 }
  0xe4   :  { %v1049_v35 = vpop.f32.mrf.mxu0  ;;  %v1692_v36 = vpop.f32.mrf.mxu1 }
  0xe6   :  { %v1694_v37 = vpop.f32.mrf.mxu0  ;;  %v1147_v38 = vpop.f32.mrf.mxu1 }
  0xe8   :  { %v1052_v39 = vpop.f32.mrf.mxu0  ;;  %v1696_v40 = vpop.f32.mrf.mxu1 }
  0xea   :  { %v1698_v41 = vpop.f32.mrf.mxu0  ;;  %v1150_v42 = vpop.f32.mrf.mxu1 }
  0xec   :  { %v1055_v43 = vpop.f32.mrf.mxu0  ;;  %v1700_v44 = vpop.f32.mrf.mxu1 }
  0xee   :  { %v251_v45 = vpop.f32.mrf.mxu0  ;;  %v1153_v46 = vpop.f32.mrf.mxu1 }
  0xef   :  { %v486_v43 = vadd.f32 %v1660_v5, %v251_v45 }
  0xf0   :  { %v1058_v47 = vpop.f32.mrf.mxu0  ;;  %v690_v48 = vpop.f32.mrf.mxu1 }
  0xf2   :  { %v256_v49 = vpop.f32.mrf.mxu0  ;;  %v1158_v50 = vpop.f32.mrf.mxu1 }
  0xf3   :  { %v1740_v50 = vld [vmem:[%s1889_s6] ss:$0 sm:$0xff] }
  0xf4   :  { %v1061_v51 = vpop.f32.mrf.mxu0  ;;  %v1702_v52 = vpop.f32.mrf.mxu1 }
  0xf6   :  { %v261_v53 = vpop.f32.mrf.mxu0  ;;  %v1161_v54 = vpop.f32.mrf.mxu1 }
  0xf8   :  { %v1064_v55 = vpop.f32.mrf.mxu0  ;;  %v1704_v56 = vpop.f32.mrf.mxu1 }
  0xfa   :  { %v1706_v57 = vpop.f32.mrf.mxu0  ;;  %v1164_v58 = vpop.f32.mrf.mxu1 }
  0xfb   :  { %v491_v58 = vadd.f32 %v1664_v9, %v256_v49 }
  0xfc   :  { %v1067_v59 = vpop.f32.mrf.mxu0  ;;  %v1708_v60 = vpop.f32.mrf.mxu1 }
  0xfe   :  { %v1710_v61 = vpop.f32.mrf.mxu0  ;;  %v1167_v62 = vpop.f32.mrf.mxu1 }
 0x100   :  { %v1070_v63 = vpop.f32.mrf.mxu0  ;;  %v1712_v1 = vpop.f32.mrf.mxu1 }
 0x102   :  { %v1714_v2 = vpop.f32.mrf.mxu0  ;;  %v1170_v3 = vpop.f32.mrf.mxu1 }
 0x104   :  { %v1073_v4 = vpop.f32.mrf.mxu0  ;;  %v1716_v7 = vpop.f32.mrf.mxu1 }
 0x106   :  { %v1718_v8 = vpop.f32.mrf.mxu0  ;;  %v1173_v11 = vpop.f32.mrf.mxu1 }
 0x108   :  { %v1076_v0 = vpop.f32.mrf.mxu0  ;;  %v1720_v14 = vpop.f32.mrf.mxu1 }
 0x10a   :  { %v1722_v15 = vpop.f32.mrf.mxu0  ;;  %v1176_v18 = vpop.f32.mrf.mxu1 }
 0x10b   :  { %v496_v18 = vadd.f32 %v1668_v12, %v261_v53  ;;  %v501_v53 = vadd.f32 %v1672_v16, %v1706_v57 }
 0x10c   :  { %v1079_v19 = vpop.f32.mrf.mxu0  ;;  %v1724_v22 = vpop.f32.mrf.mxu1 }
 0x10e   :  { %v1726_v23 = vpop.f32.mrf.mxu0  ;;  %v1179_v26 = vpop.f32.mrf.mxu1 }
 0x110   :  { %v1082_v27 = vpop.f32.mrf.mxu0  ;;  %v1728_v30 = vpop.f32.mrf.mxu1 }
 0x112   :  { %v1730_v31 = vpop.f32.mrf.mxu0  ;;  %v1182_v34 = vpop.f32.mrf.mxu1 }
 0x114   :  { %v1085_v35 = vpop.f32.mrf.mxu0  ;;  %v1732_v38 = vpop.f32.mrf.mxu1 }
 0x116   :  { %v1734_v39 = vpop.f32.mrf.mxu0  ;;  %v1185_v42 = vpop.f32.mrf.mxu1 }
 0x118   :  { %v1088_v46 = vpop.f32.mrf.mxu0  ;;  %v740_v47 = vpop.f32.mrf.mxu1 }
 0x119   :  { %v804_v51 = vadd.f32 %v740_v47, %v486_v43 }
 0x11a   :  { %v435_v54 = vpop.f32.mrf.mxu0  ;;  %v1188_v55 = vpop.f32.mrf.mxu1 }
 0x11b   :  { %v832_v59 = vadd.f32 %v1740_v50, %v804_v51  ;;  %v436_v62 = vadd.f32 %v435_v54, %v1662_v6 }
 0x11c   :  { %v1093_v63 = vpop.f32.mrf.mxu0  ;;  %v745_v3 = vpop.f32.mrf.mxu1 }
 0x11d   :  { %v853_v5 = vmax.f32 %v832_v59, 0.0  ;;  %v794_v45 = vadd.f32 %v690_v48, %v436_v62  ;;  %v805_v4 = vadd.f32 %v745_v3, %v491_v58  ;;  %v506_v59 = vadd.f32 %v1676_v20, %v1710_v61 }
 0x11e   :  { %v440_v11 = vpop.f32.mrf.mxu0  ;;  %v1191_v0 = vpop.f32.mrf.mxu1 }
 0x11f   :  { %875 = vst.msk [vmem:[%s1890_s7 + $0x50] sm:$0xff] %vm864_vm3, %v853_v5  ;;  %v822_v9 = vadd.f32 %v1740_v50, %v794_v45  ;;  %v833_v49 = vadd.f32 %v1740_v50, %v805_v4  ;;  %v441_v6 = vadd.f32 %v440_v11, %v1666_v10  ;;  %v511_v0 = vadd.f32 %v1680_v24, %v1714_v2 }
 0x120   :  { %v1096_v19 = vpop.f32.mrf.mxu0  ;;  %v750_v26 = vpop.f32.mrf.mxu1 }
 0x121   :  { %v843_v27 = vmax.f32 %v822_v9, 0.0  ;;  %v854_v48 = vmax.f32 %v833_v49, 0.0  ;;  %v795_v34 = vadd.f32 %v1702_v52, %v441_v6  ;;  %v806_v35 = vadd.f32 %v750_v26, %v496_v18 }
 0x122   :  { %v445_v42 = vpop.f32.mrf.mxu0  ;;  %v1194_v12 = vpop.f32.mrf.mxu1 }
 0x123   :  { %865 = vst.msk [vmem:[%s1890_s7] sm:$0xff] %vm864_vm3, %v843_v27  ;;  %876 = vst.msk [vmem:[%s1890_s7 + $0x58] sm:$0xff] %vm864_vm3, %v854_v48  ;;  %v823_v10 = vadd.f32 %v1740_v50, %v795_v34  ;;  %v834_v52 = vadd.f32 %v1740_v50, %v806_v35  ;;  %v446_v43 = vadd.f32 %v445_v42, %v1670_v13 }
 0x124   :  { %v1099_v46 = vpop.f32.mrf.mxu0  ;;  %v755_v47 = vpop.f32.mrf.mxu1  ;;  %v516_v48 = vadd.f32 %v1684_v28, %v1718_v8 }
 0x125   :  { %v844_v51 = vmax.f32 %v823_v10, 0.0  ;;  %v855_v16 = vmax.f32 %v834_v52, 0.0  ;;  %v796_v57 = vadd.f32 %v1704_v56, %v446_v43  ;;  %v807_v54 = vadd.f32 %v755_v47, %v501_v53 }
 0x126   :  { %v450_v55 = vpop.f32.mrf.mxu0  ;;  %v1197_v58 = vpop.f32.mrf.mxu1  ;;  %v521_v43 = vadd.f32 %v1688_v32, %v1722_v15 }
 0x127   :  { %866 = vst.msk [vmem:[%s1890_s7 + $0x8] sm:$0xff] %vm864_vm3, %v844_v51  ;;  %877 = vst.msk [vmem:[%s1890_s7 + $0x60] sm:$0xff] %vm864_vm3, %v855_v16  ;;  %v824_v13 = vadd.f32 %v1740_v50, %v796_v57  ;;  %v835_v56 = vadd.f32 %v1740_v50, %v807_v54  ;;  %v451_v62 = vadd.f32 %v450_v55, %v1674_v17 }
 0x128   :  { %v1102_v63 = vpop.f32.mrf.mxu0  ;;  %v760_v3 = vpop.f32.mrf.mxu1  ;;  %v526_v58 = vadd.f32 %v1692_v36, %v1726_v23 }
 0x129   :  { %v845_v5 = vmax.f32 %v824_v13, 0.0  ;;  %v856_v20 = vmax.f32 %v835_v56, 0.0  ;;  %v797_v61 = vadd.f32 %v1708_v60, %v451_v62  ;;  %v808_v45 = vadd.f32 %v760_v3, %v506_v59 }
 0x12a   :  { %v455_v4 = vpop.f32.mrf.mxu0  ;;  %v1200_v11 = vpop.f32.mrf.mxu1 }
 0x12b   :  { %867 = vst.msk [vmem:[%s1890_s7 + $0x10] sm:$0xff] %vm864_vm3, %v845_v5  ;;  %878 = vst.msk [vmem:[%s1890_s7 + $0x68] sm:$0xff] %vm864_vm3, %v856_v20  ;;  %v825_v17 = vadd.f32 %v1740_v50, %v797_v61  ;;  %v836_v60 = vadd.f32 %v1740_v50, %v808_v45  ;;  %v456_v18 = vadd.f32 %v455_v4, %v1678_v21 }
 0x12c   :  { %v1105_v9 = vpop.f32.mrf.mxu0  ;;  %v765_v49 = vpop.f32.mrf.mxu1  ;;  %v531_v20 = vadd.f32 %v1696_v40, %v1730_v31 }
 0x12d   :  { %v846_v6 = vmax.f32 %v825_v17, 0.0  ;;  %v857_v24 = vmax.f32 %v836_v60, 0.0  ;;  %v798_v2 = vadd.f32 %v1712_v1, %v456_v18  ;;  %v809_v19 = vadd.f32 %v765_v49, %v511_v0 }
 0x12e   :  { %v460_v26 = vpop.f32.mrf.mxu0  ;;  %v1203_v27 = vpop.f32.mrf.mxu1  ;;  %v536_v18 = vadd.f32 %v1700_v44, %v1734_v39 }
 0x12f   :  { %868 = vst.msk [vmem:[%s1890_s7 + $0x18] sm:$0xff] %vm864_vm3, %v846_v6  ;;  %879 = vst.msk [vmem:[%s1890_s7 + $0x70] sm:$0xff] %vm864_vm3, %v857_v24  ;;  %v826_v21 = vadd.f32 %v1740_v50, %v798_v2  ;;  %v837_v1 = vadd.f32 %v1740_v50, %v809_v19  ;;  %v461_v34 = vadd.f32 %v460_v26, %v1682_v25 }
 0x130   :  { %v1108_v35 = vpop.f32.mrf.mxu0  ;;  %v770_v42 = vpop.f32.mrf.mxu1 }
 0x131   :  { %v847_v12 = vmax.f32 %v826_v21, 0.0  ;;  %v858_v28 = vmax.f32 %v837_v1, 0.0  ;;  %v799_v8 = vadd.f32 %v1716_v7, %v461_v34  ;;  %v810_v53 = vadd.f32 %v770_v42, %v516_v48 }
 0x132   :  { %v465_v10 = vpop.f32.mrf.mxu0  ;;  %v1206_v52 = vpop.f32.mrf.mxu1 }
 0x133   :  { %869 = vst.msk [vmem:[%s1890_s7 + $0x20] sm:$0xff] %vm864_vm3, %v847_v12  ;;  %880 = vst.msk [vmem:[%s1890_s7 + $0x78] sm:$0xff] %vm864_vm3, %v858_v28  ;;  %v827_v25 = vadd.f32 %v1740_v50, %v799_v8  ;;  %v838_v7 = vadd.f32 %v1740_v50, %v810_v53  ;;  %v466_v46 = vadd.f32 %v465_v10, %v1686_v29 }
 0x134   :  { %v1111_v47 = vpop.f32.mrf.mxu0  ;;  %v775_v51 = vpop.f32.mrf.mxu1 }
 0x135   :  { %v848_v16 = vmax.f32 %v827_v25, 0.0  ;;  %v859_v32 = vmax.f32 %v838_v7, 0.0  ;;  %v800_v15 = vadd.f32 %v1720_v14, %v466_v46  ;;  %v811_v57 = vadd.f32 %v775_v51, %v521_v43 }
 0x136   :  { %v470_v54 = vpop.f32.mrf.mxu0  ;;  %v1209_v55 = vpop.f32.mrf.mxu1 }
 0x137   :  { %870 = vst.msk [vmem:[%s1890_s7 + $0x28] sm:$0xff] %vm864_vm3, %v848_v16  ;;  %881 = vst.msk [vmem:[%s1890_s7 + $0x80] sm:$0xff] %vm864_vm3, %v859_v32  ;;  %v828_v29 = vadd.f32 %v1740_v50, %v800_v15  ;;  %v839_v14 = vadd.f32 %v1740_v50, %v811_v57  ;;  %v471_v59 = vadd.f32 %v470_v54, %v1690_v33 }
 0x138   :  { %v1114_v13 = vpop.f32.mrf.mxu0  ;;  %v780_v56 = vpop.f32.mrf.mxu1 }
 0x139   :  { %v849_v62 = vmax.f32 %v828_v29, 0.0  ;;  %v860_v36 = vmax.f32 %v839_v14, 0.0  ;;  %v801_v23 = vadd.f32 %v1724_v22, %v471_v59  ;;  %v812_v63 = vadd.f32 %v780_v56, %v526_v58 }
 0x13a   :  { %v475_v3 = vpop.f32.mrf.mxu0  ;;  %v1212_v5 = vpop.f32.mrf.mxu1 }
 0x13b   :  { %871 = vst.msk [vmem:[%s1890_s7 + $0x30] sm:$0xff] %vm864_vm3, %v849_v62  ;;  %882 = vst.msk [vmem:[%s1890_s7 + $0x88] sm:$0xff] %vm864_vm3, %v860_v36  ;;  %v829_v33 = vadd.f32 %v1740_v50, %v801_v23  ;;  %v840_v22 = vadd.f32 %v1740_v50, %v812_v63  ;;  %v476_v61 = vadd.f32 %v475_v3, %v1694_v37 }
 0x13c   :  { %v1117_v45 = vpop.f32.mrf.mxu0  ;;  %v785_v4 = vpop.f32.mrf.mxu1 }
 0x13d   :  { %v850_v11 = vmax.f32 %v829_v33, 0.0  ;;  %v861_v40 = vmax.f32 %v840_v22, 0.0  ;;  %v802_v31 = vadd.f32 %v1728_v30, %v476_v61  ;;  %v813_v0 = vadd.f32 %v785_v4, %v531_v20 }
 0x13e   :  { %v480_v17 = vpop.f32.mrf.mxu0  ;;  %v1215_v60 = vpop.f32.mrf.mxu1 }
 0x13f   :  { %872 = vst.msk [vmem:[%s1890_s7 + $0x38] sm:$0xff] %vm864_vm3, %v850_v11  ;;  %883 = vst.msk [vmem:[%s1890_s7 + $0x90] sm:$0xff] %vm864_vm3, %v861_v40  ;;  %v830_v37 = vadd.f32 %v1740_v50, %v802_v31  ;;  %v841_v30 = vadd.f32 %v1740_v50, %v813_v0  ;;  %v481_v9 = vadd.f32 %v480_v17, %v1698_v41 }
 0x140   :  { %v1120_v49 = vpop.f32.mrf.mxu0  ;;  %v790_v6 = vpop.f32.mrf.mxu1 }
 0x141   :  { %v851_v24 = vmax.f32 %v830_v37, 0.0  ;;  %v862_v44 = vmax.f32 %v841_v30, 0.0  ;;  %v803_v39 = vadd.f32 %v1732_v38, %v481_v9  ;;  %v814_v2 = vadd.f32 %v790_v6, %v536_v18 }
 0x142   :  { %v1218_v19 = vpop.f32.mrf.mxu1 }
 0x143   :  { %873 = vst.msk [vmem:[%s1890_s7 + $0x40] sm:$0xff] %vm864_vm3, %v851_v24  ;;  %884 = vst.msk [vmem:[%s1890_s7 + $0x98] sm:$0xff] %vm864_vm3, %v862_v44  ;;  %v831_v41 = vadd.f32 %v1740_v50, %v803_v39  ;;  %v842_v26 = vadd.f32 %v1740_v50, %v814_v2 }
 0x145   :  { %v852_v27 = vmax.f32 %v831_v41, 0.0  ;;  %v863_v48 = vmax.f32 %v842_v26, 0.0 }
 0x147   :  { %874 = vst.msk [vmem:[%s1890_s7 + $0x48] sm:$0xff] %vm864_vm3, %v852_v27 }
 0x148   :  { %886 = vst.msk [vmem:[%s1890_s7 + $0xa0] sm:$0xf] %vm885_vm4, %v863_v48 }

</bundles_post_ra>
